<compile_context>
chip_gen: v7x
topology: tpu7x:2x2x1
jax: 0.10.0
libtpu: 0.0.40
codegen_flags: <defaults>
</compile_context>

<pallas_src>
import functools

import jax
import jax.numpy as jnp
import numpy as np
from jax.experimental import pallas as pl
from jax.experimental.pallas import tpu as pltpu

LANE = 128
SUBLANE = 16


def _round_up(x, m):
    return (x + m - 1) // m * m


def _pad_to(a, shape):
    return jnp.pad(a, [(0, t - s) for s, t in zip(a.shape, shape)])


# --------------------------- standalone Chomp1d kernel --------------------------
def _chomp1d_copy_kernel(x_ref, o_ref):
    # Chomp is expressed entirely in the (identical) index_maps: copying the
    # first L-chomp_size lane-tiles of each (n, :, :) slab IS the chomp.
    o_ref[...] = x_ref[...]


def chomp1d(x, chomp_size):
    """x: (N, C, L) -> x[:, :, :-chomp_size], as in the PyTorch module."""
    N, C, L = x.shape
    assert 0 < chomp_size < L
    L_out = L - chomp_size
    TL = 128                                           # lane-dense L tiles
    return pl.pallas_call(
        _chomp1d_copy_kernel,
        out_shape=jax.ShapeDtypeStruct((N, C, L_out), x.dtype),
        grid=(N, pl.cdiv(L_out, TL)),
        in_specs=[pl.BlockSpec((None, C, TL), lambda n, l: (n, 0, l))],
        out_specs=pl.BlockSpec((None, C, TL), lambda n, l: (n, 0, l)),
        compiler_params=pltpu.CompilerParams(
            dimension_semantics=("parallel", "parallel")),
    )(x)


# --------------------------- fused TCN forward kernel ---------------------------
def _tcn_fused_kernel(x_ref, rows_ref, w1_ref, b1_ref, w2_ref, b2_ref,
                      wl_ref, bl_ref, o_ref, *, k, dilations, has_down):
    h = x_ref[...].astype(jnp.float32)                 # (M, CP) f32 resident
    M, CP = h.shape
    mm_dtype = w1_ref.dtype

    # Hoisted once: per-batch-segment row index and one mask per distinct
    # nonzero shift (JAX does not CSE broadcast_in_dim -> never rebuild per tap).
    row = jnp.broadcast_to(rows_ref[...], (M, CP))     # local t within segment
    shifts = sorted({d * (k - 1 - j) for d in dilations for j in range(k)} - {0})
    masks = {s: row >= s for s in shifts}

    def shift(a, s):
        # y[t] = a[t - s] within each length-Lp batch segment, 0 for local
        # t < s  (== Conv1d left pad + Chomp1d).  pltpu.roll runs in the XLU
        # slot; the select is a single VPU op.
        if s == 0:
            return a
        return jnp.where(masks[s], pltpu.roll(a, shift=s, axis=0), 0.0)

    def taps(a, d):
        # Fold the k dilated taps into one (M, k*CP) operand: a single MXU
        # matmul with a k*CP-deep contraction (fills the 256x256 MXU).
        return jnp.concatenate(
            [shift(a, d * (k - 1 - j)) for j in range(k)], axis=-1
        ).astype(mm_dtype)

    for i, (d, down) in enumerate(zip(dilations, has_down)):
        # conv1 (+ fused 1x1 downsample living in columns [CP:2CP] of the same
        # widened weight): one MXU pass gives both h1 and the residual branch.
        z = jnp.dot(taps(h, d), w1_ref[i],
                    preferred_element_type=jnp.float32) + b1_ref[i]
        h1 = jnp.maximum(z[:, :CP], 0.0)               # f32 bias+ReLU
        res = z[:, CP:] if down else h                 # residual branch, f32
        # conv2
        h2 = jnp.dot(taps(h1, d), w2_ref[i],
                     preferred_element_type=jnp.float32) + b2_ref[i]
        h2 = jnp.maximum(h2, 0.0)
        h = jnp.maximum(h2 + res, 0.0)                 # block output, f32

    o_ref[...] = (jnp.dot(h.astype(wl_ref.dtype), wl_ref[...],
                          preferred_element_type=jnp.float32)
                  + bl_ref[...]).astype(o_ref.dtype)


def tcn_forward(x, params):
    """x: (N, C_in, L) as in PyTorch.  Returns (N, L, dim_size) float32."""
    N, cin, L = x.shape
    k = params["kernel_size"]
    blocks = params["blocks"]
    dim = params["dim_size"]

    Lp = _round_up(max(L, SUBLANE), SUBLANE)
    CP = _round_up(max([cin] + [b["out_c"] for b in blocks]), LANE)
    DP = _round_up(dim, LANE)
    M = N * Lp

    # (N, C, L) -> (N*Lp, CP): batch folded into the matmul M dimension (one
    # grid-less pallas_call; causal shifts are masked per length-Lp segment so
    # batches never mix).
    y = jnp.transpose(x, (0, 2, 1)).astype(jnp.float32)
    y = _pad_to(y, (N, Lp, CP)).reshape(M, CP).astype(jnp.bfloat16)
    rows = (jnp.arange(M, dtype=jnp.int32) % Lp).reshape(M, 1)

    def prep_conv(w):   # PyTorch (C_out, C_in, K) -> (K, CP, CP) stacked taps
        return _pad_to(jnp.transpose(w, (2, 1, 0)), (k, CP, CP))

    w1s, b1s, w2s, b2s = [], [], [], []
    for blk in blocks:
        # Widen conv1 weight to 2*CP output columns; the 1x1 downsample sits in
        # the shift-0 tap rows ([(k-1)*CP : k*CP]) of columns [CP:2CP].
        w1w = jnp.zeros((k, CP, 2 * CP), jnp.float32)
        w1w = w1w.at[:, :, :CP].set(prep_conv(blk["w1"]))
        b1w = jnp.zeros((1, 2 * CP), jnp.float32)
        b1w = b1w.at[:, :CP].set(_pad_to(blk["b1"][None, :], (1, CP)))
        if blk["has_down"]:
            w1w = w1w.at[k - 1, :, CP:].set(
                _pad_to(jnp.transpose(blk["wd"]), (CP, CP)))
            b1w = b1w.at[:, CP:].set(_pad_to(blk["bd"][None, :], (1, CP)))
        w1s.append(w1w.reshape(k * CP, 2 * CP))
        b1s.append(b1w)
        w2s.append(prep_conv(blk["w2"]).reshape(k * CP, CP))
        b2s.append(_pad_to(blk["b2"][None, :], (1, CP)))

    w1 = jnp.stack(w1s).astype(jnp.bfloat16)
    b1 = jnp.stack(b1s)
    w2 = jnp.stack(w2s).astype(jnp.bfloat16)
    b2 = jnp.stack(b2s)
    w_lin = _pad_to(jnp.transpose(params["w_lin"]), (CP, DP)).astype(jnp.bfloat16)
    b_lin = _pad_to(params["b_lin"][None, :], (1, DP))

    kern = functools.partial(
        _tcn_fused_kernel, k=k,
        dilations=tuple(int(b["dilation"]) for b in blocks),
        has_down=tuple(bool(b["has_down"]) for b in blocks))

    out = pl.pallas_call(
        kern,
        out_shape=jax.ShapeDtypeStruct((M, DP), jnp.float32),
        compiler_params=pltpu.CompilerParams(
            vmem_limit_bytes=64 * 1024 * 1024),
    )(y, rows, w1, b1, w2, b2, w_lin, b_lin)
    return out.reshape(N, Lp, DP)[:, :L, :dim]


# ------------------------------- init + reference -------------------------------
def init_tcn_params(key, input_size, dim_size, num_channels, kernel_size):
    blocks = []
    in_c = input_size
    for i, out_c in enumerate(num_channels):
        bk = jax.random.fold_in(key, i)
        k1, k2, k3, k4, k5, k6 = jax.random.split(bk, 6)
        blocks.append(dict(
            w1=0.01 * jax.random.normal(k1, (out_c, in_c, kernel_size), jnp.float32),
            b1=0.01 * jax.random.normal(k2, (out_c,), jnp.float32),
            w2=0.01 * jax.random.normal(k3, (out_c, out_c, kernel_size), jnp.float32),
            b2=0.01 * jax.random.normal(k4, (out_c,), jnp.float32),
            wd=0.01 * jax.random.normal(k5, (out_c, in_c), jnp.float32),
            bd=0.01 * jax.random.normal(k6, (out_c,), jnp.float32),
            dilation=2 ** i,
            has_down=(in_c != out_c),
            in_c=in_c,
            out_c=out_c,
        ))
        in_c = out_c
    kl1, kl2 = jax.random.split(jax.random.fold_in(key, 1000))
    return dict(
        blocks=blocks,
        w_lin=0.01 * jax.random.normal(kl1, (dim_size, num_channels[-1]), jnp.float32),
        b_lin=0.01 * jax.random.normal(kl2, (dim_size,), jnp.float32),
        input_size=input_size,
        dim_size=dim_size,
        kernel_size=kernel_size,
    )


def _ref_causal_conv(x, w, b, dilation):
    # x: (N, L, C_in); w: PyTorch (C_out, C_in, K); Conv1d(left pad) + Chomp1d.
    cout, cin, K = w.shape
    N, L, _ = x.shape
    out = jnp.broadcast_to(b, (N, L, cout)).astype(jnp.float32)
    for j in range(K):
        s = dilation * (K - 1 - j)
        xs = jnp.pad(x, ((0, 0), (s, 0), (0, 0)))[:, :L, :]
        out = out + jnp.einsum("nlc,oc->nlo", xs, w[:, :, j])
    return out


def tcn_reference(x, params):
    y = jnp.transpose(x, (0, 2, 1)).astype(jnp.float32)
    for blk in params["blocks"]:
        h = jax.nn.relu(_ref_causal_conv(y, blk["w1"], blk["b1"], blk["dilation"]))
        h = jax.nn.relu(_ref_causal_conv(h, blk["w2"], blk["b2"], blk["dilation"]))
        res = (jnp.einsum("nlc,oc->nlo", y, blk["wd"]) + blk["bd"]
               if blk["has_down"] else y)
        y = jax.nn.relu(h + res)
    return jnp.einsum("nlc,oc->nlo", y, params["w_lin"]) + params["b_lin"]


if __name__ == "__main__":
    key = jax.random.PRNGKey(0)
    input_size, dim_size = 4, 6
    num_channels = [8, 8, 12]          # dilations 1, 2, 4
    kernel_size = 2
    N, L = 2, 16

    pkey, xkey = jax.random.split(key)
    params = init_tcn_params(pkey, input_size, dim_size, num_channels, kernel_size)
    x = jax.random.normal(xkey, (N, input_size, L), jnp.float32)   # (N, C_in, L)

    # 1) Literal Chomp1d kernel (the spec module), exact check.
    chomped = jax.block_until_ready(chomp1d(x, chomp_size=1))
    np.testing.assert_array_equal(np.asarray(chomped), np.asarray(x[:, :, :-1]))

    # 2) Fused TCN forward (Chomp1d realized as masked causal rolls inside the conv).
    out = jax.block_until_ready(tcn_forward(x, params))
    assert out.shape == (N, L, dim_size), out.shape

    ref = tcn_reference(x, params)
    # bf16 matmul operands with f32 accumulation -> loosened tolerance.
    np.testing.assert_allclose(np.asarray(out), np.asarray(ref),
                               rtol=5e-2, atol=5e-3)
    print("KERNEL_OK")
</pallas_src>

<mosaic_0001>
module attributes {stable_mosaic.version = 11 : i64} {
  func.func @_chomp1d_copy_kernel(%arg0: i32, %arg1: i32, %arg2: memref<1x4x128xf32, #tpu.memory_space<vmem>>, %arg3: memref<1x4x128xf32, #tpu.memory_space<vmem>>) attributes {dimension_semantics = [#tpu.dimension_semantics<parallel>, #tpu.dimension_semantics<parallel>], iteration_bounds = array<i64: 2, 1>, scalar_prefetch = 0 : i64, scratch_operands = 0 : i64, tpu.core_type = #tpu.core_type<tc>, window_params = [{transform_indices = @transform_0, window_bounds = array<i64: 1, 4, 128>}, {transform_indices = @transform_1, window_bounds = array<i64: 1, 4, 128>}]} {
    %c0 = arith.constant 0 : index
    %c0_0 = arith.constant 0 : index
    %c0_1 = arith.constant 0 : index
    %0 = vector.load %arg2[%c0, %c0_0, %c0_1] : memref<1x4x128xf32, #tpu.memory_space<vmem>>, vector<1x4x128xf32>
    %1 = vector.shape_cast %0 : vector<1x4x128xf32> to vector<4x128xf32>
    %c0_2 = arith.constant 0 : index
    %c0_3 = arith.constant 0 : index
    %c0_4 = arith.constant 0 : index
    %2 = vector.load %arg3[%c0_2, %c0_3, %c0_4] : memref<1x4x128xf32, #tpu.memory_space<vmem>>, vector<1x4x128xf32>
    %3 = vector.shape_cast %2 : vector<1x4x128xf32> to vector<4x128xf32>
    %4 = vector.shape_cast %1 : vector<4x128xf32> to vector<1x4x128xf32>
    tpu.vector_store %arg3[%c0_2, %c0_3, %c0_4], %4 {strides = array<i32>} : memref<1x4x128xf32, #tpu.memory_space<vmem>>, vector<1x4x128xf32>,
    return
  }
  func.func @transform_0(%arg0: i32, %arg1: i32) -> (i32, i32, i32) {
    %c0_i32 = arith.constant 0 : i32
    %c0_i32_0 = arith.constant 0 : i32
    return %arg0, %c0_i32, %arg1 : i32, i32, i32
  }
  func.func @transform_1(%arg0: i32, %arg1: i32) -> (i32, i32, i32) {
    %c0_i32 = arith.constant 0 : i32
    %c0_i32_0 = arith.constant 0 : i32
    return %arg0, %c0_i32, %arg1 : i32, i32, i32
  }
}

</mosaic_0001>

<bundles_post_ra>
// kernel: tpu_custom_call.1
= control target key start
LH: loop header
LB: loop body
LE: loop exit
PB: predicated region body
PF: predicated region fallthrough
CT: control target
= control target key end

     0   :  { %6 = vsyncpa [#allocation3], 0  ;;  %s619_s0 = inlined_call_operand.hbm [shape: f32[2,4,16], index: 0, kind: input, shape index: {}]   ;;  %s620_s1 = inlined_call_operand.hbm [shape: f32[2,4,15], index: 1, kind: output, shape index: {}]  }
   0x1   :  { %8 = vsyncpa [#allocation3 + $0x1], 0 }
   0x2   :  { %9 = vsyncpa [#allocation4], 0 }
   0x3   :  { %11 = vsyncpa [#allocation4 + $0x1], 0  ;;  %s447_s6 = smov 0   ;;  %s449_s7 = smov 0  }
   0x4   :  { %s451_s8 = smov 0   ;;  %s453_s9 = smov 0  }
   0x5   :  { %s455_s10 = smov 0   ;;  %s457_s11 = smov 0  }
   0x6 LB: > { %s246_s12 = sadd.s32 4294967295, %s433_s11   ;;  %s247_s13 = sadd.s32 4294967294, %s433_s11   ;;  %s433_s11 = sphi %s457_s11, %s17_s11   ;;  %s429_s10 = sphi %s455_s10, %s636_s10   ;;  %s425_s9 = sphi %s453_s9, %s635_s9   ;;  %s421_s8 = sphi %s451_s8, %s634_s8   ;;  %s417_s7 = sphi %s449_s7, %s633_s7   ;;  %s413_s6 = sphi %s447_s6, %s632_s6  }
   0x7   : > { %s29_s14 = sadd.s32 1, %s429_s10  ;;  %s38_s15 = sadd.s32 1, %s421_s8 }
   0x8   : > { %p31_p0 = scmp.ge.s32.totalorder %s29_s14, 2  ;;  %p45_p1 = scmp.ne.s32.totalorder %s421_s8, %s417_s7 }
   0x9   : > { %p46_p2 = scmp.eq.s32.totalorder %s433_s11, 0  ;;  %p51_p3 = scmp.ne.s32.totalorder %s417_s7, %s413_s6 }
   0xa   : > { %s638_s14 = smov (%p31_p0, %s29_s14), 0  ;;  %p52_p5 = scmp.eq.s32.totalorder %s246_s12, 0 }
   0xb   : > { %p488_p4 = por %p46_p2, %p45_p1  ;;  %s33_s17 = ssub.s32 %s429_s10, %s638_s14 }
   0xc   : > { %p77_p6 = scmp.eq.s32.totalorder %s246_s12, 1  ;;  %p36_p7 = scmp.eq.s32.totalorder %s33_s17, 0 }
   0xd   : > { %p494_p8 = por %p52_p5, %p51_p3  ;;  %p83_p10 = scmp.eq.s32.totalorder %s247_s13, 1 }
   0xe   : > { %p498_p9 = por %p77_p6, %p45_p1  ;;  %p271_p13 = scmp.lt.s32.totalorder %s433_s11, 2 }
   0xf   : > { %s503_s20 = scalar_select %p36_p7, %s421_s8, %s38_s15  }
  0x10   : > { %s624_s19 = scalar_select %p498_p9, 1, 0 }
  0x11   : > { %p505_p11 = por %p83_p10, %p51_p3  ;;  %s103_s22 = sand.u32 1, %s421_s8  }
  0x12   : > { %s250_s23 = sshll.u32 %s103_s22, 2  ;;  %s251_s24 = sshll.u32 %s429_s10, 6 }
  0x13   : > { %s625_s21 = scalar_select %p505_p11, 1, 0 }
  0x14   : > { %s516_s27 = scalar_lea.hbm %s619_s0, %s251_s24  ;;  %s107_s28 = scalar_lea.vmem [#allocation2], %s250_s23 }
  0x15   : > { %s115_s29 = sshll.u32 %s107_s28, 4  ;;  %p522_p0 = pnand %p271_p13, %p488_p4  ;;  %s518_s29 = int_to_ptr.vmem [resolvable:$true] %s115_s29 }
  0x16   : > { %s104_s2 = scalar_lea.sflag [#allocation3], %s103_s22  ;;  %s321_s3 = scalar_lea.hbm %s516_s27, 64 }
  0x17   : > { %p322_p3 = scmp.ne.s32.totalorder %s516_s27, %s321_s3  ;;  %p323_p5 = pneg %p522_p0 }
  0x18   : > { %s326_s12 = scalar_lea.hbm %s619_s0, 128  ;;  %p327_p4 = scmp.lt.u32.totalorder %s516_s27, %s619_s0 }
  0x19   : > { %p324_p6 = pnand %p323_p5, %p322_p3  ;;  %p328_p10 = scmp.lt.u32.totalorder %s326_s12, %s321_s3 }
  0x1a   : > { %p330_p12 = scmp.lt.u32.totalorder %s321_s3, %s516_s27 }
  0x1b   : > { %p325_p7 = pneg %p324_p6  ;;  %p329_p13 = por %p328_p10, %p327_p4 }
  0x1d   : > { %p331_p1 = por %p330_p12, %p329_p13 }
  0x1f   : > { %p332_p2 = pnand %p331_p1, %p325_p7 }
  0x21   : > { %335 = shalt.err (!%p332_p2)
}
  0x22   : > { %s336_s16 = scalar_lea.vmem %s518_s29, 64  ;;  %s435_s17 = smov [#allocation2]  }
  0x23   : > { %p337_p3 = scmp.ne.s32.totalorder %s518_s29, %s336_s16  ;;  %s341_s22 = sshll.u32 %s435_s17, 4  ;;  %s342_s22 = int_to_ptr.vmem [resolvable:$false] %s341_s22 }
  0x24   : > { %s343_s23 = scalar_lea.vmem %s342_s22, 128  ;;  %p344_p9 = scmp.lt.s32.totalorder %s518_s29, %s342_s22 }
  0x25   : > { %p339_p6 = pnand %p337_p3, %p323_p5  ;;  %p345_p4 = scmp.lt.s32.totalorder %s343_s23, %s336_s16 }
  0x27   : > { %p340_p11 = pneg %p339_p6  ;;  %p346_p10 = por %p345_p4, %p344_p9 }
  0x29   : > { %p347_p12 = pnand %p346_p10, %p340_p11 }
  0x2b   : > { %350 = shalt.err (!%p347_p12)
}
  0x2c   : > { %266 = dma.hbm_to_vmem [thread:$0]  (!%p522_p0), %s516_s27, 64, %s518_s29, %s104_s2  }
  0x2d   : > { %p627_p1 = scmp.lt.s32.totalorder %s433_s11, 3  ;;  %p628_p2 = scmp.ge.s32.totalorder %s433_s11, 1 }
  0x2f   : > { %p121_p5 = pnand %p628_p2, %p627_p1 }
  0x30   : > { %s558_s24 = sand.u32 (!%p121_p5), 1, %s417_s7  }
  0x31   : > { %124 = sbr.rel (%p121_p5) target bundleno = 83 (0x53), region = 24  ;;  %s253_s25 = sshll.u32 (!%p121_p5), %s558_s24, 2 }
  0x32   : > { %s127_s26 = scalar_lea.sflag (!%p121_p5), [#allocation3], %s558_s24  ;;  %s130_s28 = scalar_lea.vmem (!%p121_p5), [#allocation2], %s253_s25 }
  0x38   : > { %404 = dma.done.wait (%p494_p8), %s127_s26, 64  }
  0x39   : > { %406 = vsyncadd (%p494_p8), %s127_s26, 4294967232  ;;  %s148_s27 = scalar_lea.vmem [#allocation5], %s253_s25  ;;  %s256_s30 = sshll.u32 %s425_s9, 6  ;;  %v149_v0 = vld [vmem:[%s130_s28] sm:$0xf] }
  0x3a   : > { %s166_s29 = sshll.u32 %s148_s27, 4  ;;  %s572_s4 = scalar_lea.hbm %s620_s1, %s256_s30  ;;  %150 = vst [vmem:[%s148_s27] sm:$0xf] %v149_v0  ;;  %s567_s29 = int_to_ptr.vmem [resolvable:$true] %s166_s29 }
  0x3b   : > { %s152_s18 = scalar_lea.sflag [#allocation4], %s558_s24  ;;  %s351_s5 = scalar_lea.vmem %s567_s29, 64 }
  0x3c   : > { %p352_p8 = scmp.ne.s32.totalorder %s567_s29, %s351_s5  ;;  %p629_p9 = scmp.ne.s32.totalorder %s624_s19, 0 }
  0x3d   : > { %s436_s12 = smov [#allocation5]  }
  0x3e   : > { %p353_p11 = pnand %p352_p8, %p629_p9  ;;  %s355_s9 = sshll.u32 %s436_s12, 4  ;;  %s356_s9 = int_to_ptr.vmem [resolvable:$false] %s355_s9 }
  0x3f   : > { %s357_s13 = scalar_lea.vmem %s356_s9, 128  ;;  %p358_p7 = scmp.lt.s32.totalorder %s567_s29, %s356_s9 }
  0x40   : > { %p354_p0 = pneg %p353_p11  ;;  %p359_p13 = scmp.lt.s32.totalorder %s357_s13, %s351_s5 }
  0x42   : > { %p360_p3 = por %p359_p13, %p358_p7 }
  0x44   : > { %p361_p6 = pnand %p360_p3, %p354_p0 }
  0x46   : > { %364 = shalt.err (!%p361_p6)
}
  0x47   : > { %s365_s15 = scalar_lea.hbm %s572_s4, 64  ;;  %s369_s22 = scalar_lea.hbm %s620_s1, 128 }
  0x48   : > { %p366_p4 = scmp.ne.s32.totalorder %s572_s4, %s365_s15  ;;  %p370_p1 = scmp.lt.u32.totalorder %s572_s4, %s620_s1 }
  0x49   : > { %p371_p2 = scmp.lt.u32.totalorder %s369_s22, %s365_s15  ;;  %p373_p8 = scmp.lt.u32.totalorder %s365_s15, %s572_s4 }
  0x4a   : > { %p367_p10 = pnand %p366_p4, %p629_p9 }
  0x4b   : > { %p372_p5 = por %p371_p2, %p370_p1 }
  0x4c   : > { %p368_p12 = pneg %p367_p10 }
  0x4d   : > { %p374_p11 = por %p373_p8, %p372_p5 }
  0x4f   : > { %p375_p0 = pnand %p374_p11, %p368_p12 }
  0x51   : > { %378 = shalt.err (!%p375_p0)
}
  0x52   : > { %261 = dma.vmem_to_hbm [thread:$0]  (%p629_p9), %s567_s29, 64, %s572_s4, %s152_s18  }
  0x53 PF: > { %s178_s25 = sand.u32 1, %s413_s6   ;;  %p630_p7 = scmp.ne.s32.totalorder %s625_s21, 0 }
  0x54   : > { %p631_p13 = scmp.ge.s32.totalorder %s433_s11, 2  ;;  %s179_s26 = scalar_lea.sflag [#allocation4], %s178_s25 }
  0x56   : > { %p268_p3 = pnand %p631_p13, %p630_p7 }
  0x58   : > { %408 = dma.done.wait (!%p268_p3), %s179_s26, 64  }
  0x59   : > { %410 = vsyncadd (!%p268_p3), %s179_s26, 4294967232  ;;  %s17_s11 = sadd.s32 1, %s433_s11   ;;  %s632_s6 = smov %s417_s7 }
  0x5a   : > { %p14_p6 = scmp.ge.s32.totalorder %s17_s11, 4   ;;  %s633_s7 = smov %s421_s8 }
  0x5b   : > { %s634_s8 = smov %s503_s20  ;;  %s635_s9 = smov %s429_s10 }
  0x5c   : > { %s636_s10 = smov %s638_s14  ;;  %16 = sbr.rel (!%p14_p6) target bundleno = 6 (0x6), region = 69 }
  0x63   :  { %184 = vsyncpa [#allocation3], 1 }
  0x64   :  { %186 = vsyncpa [#allocation3 + $0x1], 1 }
  0x65   :  { %187 = vsyncpa [#allocation4], 1 }
  0x66   :  { %189 = vsyncpa [#allocation4 + $0x1], 1 }

</bundles_post_ra>
